<compile_context>
chip_gen: v7x
topology: tpu7x:2x2x1
jax: 0.10.0
libtpu: 0.0.40
codegen_flags: <defaults>
</compile_context>

<pallas_src>
import math
import functools

import jax
import jax.numpy as jnp
from jax.experimental import pallas as pl
from jax.experimental.pallas import tpu as pltpu


def _cross_attn_block_kernel(num_heads, head_dim, eps, bt, lq, lk, emb, mm_dtype,
                             ep_ref, tcr_ref,
                             wq_ref, wkv_ref, wo_ref,
                             bq_ref, bkv_ref, bo_ref,
                             gamma_ref, beta_ref,
                             out_ref,
                             attn_scratch):
    """One grid step == `bt` batch elements.

    The QKV / output projections fold the batch block into the matmul M dim
    ((bt*L, E) @ (E, *)); only the per-head score / PV matmuls are batched per
    batch element.  Weights arrive pre-transposed ((E_in, E_out)) and K/V are
    fused into one (E, 2E) weight, so there is no in-kernel transpose.
    """
    f32 = jnp.float32
    mq = bt * lq
    mk = bt * lk

    def mx(x):  # cast only at MXU (dot) boundaries; VPU math stays f32 (v5e-safe).
        return x if mm_dtype is None else x.astype(mm_dtype)

    ep = ep_ref[...].reshape(mq, emb)      # (bt*Lq, E)  query rows
    tcr = tcr_ref[...].reshape(mk, emb)    # (bt*Lk, E)  key/value rows

    # Fused projections with f32 accumulation.
    q = jnp.dot(mx(ep), wq_ref[...], preferred_element_type=f32) + bq_ref[...].astype(f32)
    kv = jnp.dot(mx(tcr), wkv_ref[...], preferred_element_type=f32) + bkv_ref[...].astype(f32)

    # Fold the 1/sqrt(Dh) scale into Q once (cheaper than scaling every score tile).
    q = q * (1.0 / math.sqrt(head_dim))

    # Per-head attention; each head writes its (bt*Lq, Dh) slab into a fixed
    # VMEM-scratch slice instead of a lane-axis concatenate.
    for h in range(num_heads):
        lo = h * head_dim
        hi = lo + head_dim
        qh = q[:, lo:hi].reshape(bt, lq, head_dim)
        kh = kv[:, lo:hi].reshape(bt, lk, head_dim)
        vh = kv[:, emb + lo:emb + hi].reshape(bt, lk, head_dim)

        # Scores contract over Dh for both operands -> no materialized transpose.
        s = jnp.einsum("bqd,bkd->bqk", mx(qh), mx(kh),
                       preferred_element_type=f32)            # (bt, Lq, Lk)
        m = jnp.max(s, axis=-1, keepdims=True)
        p = jnp.exp(s - m)
        # One reciprocal per row, then a broadcast multiply (cheaper than a
        # per-element divide).  approx=True (EUP) is a further option when a
        # ~2^-12 relative error in softmax weights is acceptable.
        inv = pl.reciprocal(jnp.sum(p, axis=-1, keepdims=True), approx=False)
        p = p * inv
        oh = jnp.einsum("bqk,bkd->bqd", mx(p), mx(vh),
                        preferred_element_type=f32)           # (bt, Lq, Dh)
        attn_scratch[:, lo:hi] = oh.reshape(mq, head_dim)

    # Output projection + residual + LayerNorm (all VPU math in f32).
    o = jnp.dot(mx(attn_scratch[...]), wo_ref[...],
                preferred_element_type=f32) + bo_ref[...].astype(f32)
    x = ep.astype(f32) + o
    mu = jnp.mean(x, axis=-1, keepdims=True)
    xc = x - mu
    var = jnp.mean(xc * xc, axis=-1, keepdims=True)
    y = xc * jax.lax.rsqrt(var + eps)
    y = y * gamma_ref[...].astype(f32) + beta_ref[...].astype(f32)

    # TODO(synk): for E not a multiple of 128 this (..., E)-wide store is masked;
    # a lane-folded (bt, Lq*E) output slab would be dense, but the required
    # in-kernel minor-dim reshape is not reliably lowered by Mosaic, so we keep
    # the natural layout (already lane-dense for production E % 128 == 0).
    out_ref[...] = y.reshape(bt, lq, emb).astype(out_ref.dtype)


def _pick_batch_block(batch, lq):
    """Fold batches into the matmul M dim (target ~128 rows), while keeping at
    least 2 grid steps when possible so v7x can shard the grid over its 2 TCs."""
    cap = max(1, 128 // max(lq, 1))
    best = 1
    for bt in range(1, batch + 1):
        if batch % bt != 0 or bt > cap:
            continue
        if batch >= 2 and batch // bt < 2:
            continue
        best = bt
    return best


def cross_attention_block(tcr_emb, epitope_emb, params, *, num_heads,
                          eps=1e-5, mxu_dtype=None, batch_block=None):
    """Matches CrossAttentionBlock.forward(tcr_emb, epitope_emb):
         attn_out = MHA(query=epitope_emb, key=tcr_emb, value=tcr_emb)   (eval mode)
         return LayerNorm(epitope_emb + attn_out)

    `params` uses the PyTorch layout: w* is (E_out, E_in) applied as x @ w.T,
    biases / gamma / beta are (1, E).
    `mxu_dtype` (e.g. jnp.bfloat16) casts only the MXU operands (v6e/v7x path);
    softmax, residual and LayerNorm remain float32.
    """
    B, Lq, E = epitope_emb.shape
    Bk, Lk, Ek = tcr_emb.shape
    assert B == Bk and E == Ek and E % num_heads == 0
    head_dim = E // num_heads

    bt = batch_block if batch_block is not None else _pick_batch_block(B, Lq)
    assert B % bt == 0
    grid = (B // bt,)

    wdt = mxu_dtype if mxu_dtype is not None else params["wq"].dtype
    # Pre-transpose to (E_in, E_out) so no in-kernel transpose; fuse K/V.
    wq_t = params["wq"].T.astype(wdt)                                               # (E, E)
    wkv_t = jnp.concatenate([params["wk"].T, params["wv"].T], axis=-1).astype(wdt)  # (E, 2E)
    wo_t = params["wo"].T.astype(wdt)                                               # (E, E)
    bq = params["bq"].astype(jnp.float32)                                           # (1, E)
    bkv = jnp.concatenate([params["bk"], params["bv"]], axis=-1).astype(jnp.float32)  # (1, 2E)
    bo = params["bo"].astype(jnp.float32)
    gamma = params["gamma"].astype(jnp.float32)
    beta = params["beta"].astype(jnp.float32)

    kernel = functools.partial(_cross_attn_block_kernel,
                               num_heads, head_dim, eps, bt, Lq, Lk, E, mxu_dtype)

    # Weights use a constant index_map (never change across the grid): single-buffer
    # them when double-buffering would pressure VMEM (matters on v7x's 64 MiB).
    wbytes = (E * E + E * 2 * E + E * E) * wq_t.dtype.itemsize
    wpipe = pl.Buffered(1) if 2 * wbytes > (8 << 20) else None
    const2d = lambda b: (0, 0)

    in_specs = [
        pl.BlockSpec((bt, Lq, E), lambda b: (b, 0, 0)),           # epitope (query)
        pl.BlockSpec((bt, Lk, E), lambda b: (b, 0, 0)),           # tcr (key/value)
        pl.BlockSpec((E, E), const2d, pipeline_mode=wpipe),       # wq^T
        pl.BlockSpec((E, 2 * E), const2d, pipeline_mode=wpipe),   # [wk^T | wv^T]
        pl.BlockSpec((E, E), const2d, pipeline_mode=wpipe),       # wo^T
        pl.BlockSpec((1, E), const2d),                            # bq
        pl.BlockSpec((1, 2 * E), const2d),                        # [bk | bv]
        pl.BlockSpec((1, E), const2d),                            # bo
        pl.BlockSpec((1, E), const2d),                            # gamma
        pl.BlockSpec((1, E), const2d),                            # beta
    ]

    grid_spec = pltpu.PrefetchScalarGridSpec(
        num_scalar_prefetch=0,
        grid=grid,
        in_specs=in_specs,
        out_specs=pl.BlockSpec((bt, Lq, E), lambda b: (b, 0, 0)),
        scratch_shapes=[pltpu.VMEM((bt * Lq, E), jnp.float32)],
    )

    # Advisory cost estimate so XLA schedules neighbors around the custom call.
    flops = 2 * B * (Lq * E * E + Lk * E * (2 * E) + 2 * Lq * Lk * E + Lq * E * E)
    transcendentals = B * num_heads * Lq * Lk + B * Lq
    bytes_accessed = (epitope_emb.size * epitope_emb.dtype.itemsize
                      + tcr_emb.size * tcr_emb.dtype.itemsize
                      + int(wbytes)
                      + B * Lq * E * epitope_emb.dtype.itemsize)

    return pl.pallas_call(
        kernel,
        out_shape=jax.ShapeDtypeStruct((B, Lq, E), epitope_emb.dtype),
        grid_spec=grid_spec,
        compiler_params=pltpu.CompilerParams(
            dimension_semantics=("parallel",)),
        cost_estimate=pl.CostEstimate(
            flops=int(flops),
            transcendentals=int(transcendentals),
            bytes_accessed=int(bytes_accessed)),
    )(epitope_emb, tcr_emb, wq_t, wkv_t, wo_t, bq, bkv, bo, gamma, beta)


def _reference(tcr_emb, epitope_emb, params, *, num_heads, eps=1e-5):
    """Pure-JAX reference matching PyTorch MHA (eval) + residual + LayerNorm."""
    B, Lq, E = epitope_emb.shape
    _, Lk, _ = tcr_emb.shape
    Dh = E // num_heads
    q = epitope_emb @ params["wq"].T + params["bq"][0]
    k = tcr_emb @ params["wk"].T + params["bk"][0]
    v = tcr_emb @ params["wv"].T + params["bv"][0]
    q = q.reshape(B, Lq, num_heads, Dh).transpose(0, 2, 1, 3)
    k = k.reshape(B, Lk, num_heads, Dh).transpose(0, 2, 1, 3)
    v = v.reshape(B, Lk, num_heads, Dh).transpose(0, 2, 1, 3)
    s = jnp.einsum("bhqd,bhkd->bhqk", q, k) / math.sqrt(Dh)
    p = jax.nn.softmax(s, axis=-1)
    a = jnp.einsum("bhqk,bhkd->bhqd", p, v).transpose(0, 2, 1, 3).reshape(B, Lq, E)
    o = a @ params["wo"].T + params["bo"][0]
    x = epitope_emb + o
    mu = x.mean(-1, keepdims=True)
    var = ((x - mu) ** 2).mean(-1, keepdims=True)
    return (x - mu) / jnp.sqrt(var + eps) * params["gamma"][0] + params["beta"][0]


if __name__ == "__main__":
    B, Lq, Lk, E, H = 2, 8, 16, 32, 4  # embed_dim=32, num_heads=4

    key = jax.random.PRNGKey(0)
    ks = jax.random.split(key, 12)
    scale = 0.1
    params = {
        "wq": scale * jax.random.normal(ks[0], (E, E), jnp.float32),
        "wk": scale * jax.random.normal(ks[1], (E, E), jnp.float32),
        "wv": scale * jax.random.normal(ks[2], (E, E), jnp.float32),
        "wo": scale * jax.random.normal(ks[3], (E, E), jnp.float32),
        "bq": scale * jax.random.normal(ks[4], (1, E), jnp.float32),
        "bk": scale * jax.random.normal(ks[5], (1, E), jnp.float32),
        "bv": scale * jax.random.normal(ks[6], (1, E), jnp.float32),
        "bo": scale * jax.random.normal(ks[7], (1, E), jnp.float32),
        "gamma": jnp.ones((1, E), jnp.float32),
        "beta": jnp.zeros((1, E), jnp.float32),
    }

    epitope_emb = jax.random.normal(ks[8], (B, Lq, E), jnp.float32)  # query
    tcr_emb = jax.random.normal(ks[9], (B, Lk, E), jnp.float32)      # key / value

    ref = _reference(tcr_emb, epitope_emb, params, num_heads=H)

    # f32 path (tight comparison against the pure-JAX reference).
    out = cross_attention_block(tcr_emb, epitope_emb, params, num_heads=H)
    out = jax.block_until_ready(out)
    assert out.shape == (B, Lq, E)
    assert jnp.allclose(out, ref, atol=1e-4, rtol=1e-4), "f32 mismatch vs JAX reference"

    # bf16 MXU-operand path (v6e/v7x recommendation); VPU math stays f32.
    out_bf16 = cross_attention_block(tcr_emb, epitope_emb, params, num_heads=H,
                                     mxu_dtype=jnp.bfloat16)
    out_bf16 = jax.block_until_ready(out_bf16)
    assert jnp.allclose(out_bf16, ref, atol=5e-2, rtol=5e-2), "bf16 mismatch vs JAX reference"

    print("KERNEL_OK")
</pallas_src>

<mosaic_0001>
module attributes {stable_mosaic.version = 11 : i64} {
  func.func @_cross_attn_block_kernel(%arg0: i32, %arg1: memref<1x8x32xf32, #tpu.memory_space<vmem>>, %arg2: memref<1x16x32xf32, #tpu.memory_space<vmem>>, %arg3: memref<32x32xf32, #tpu.memory_space<vmem>>, %arg4: memref<32x64xf32, #tpu.memory_space<vmem>>, %arg5: memref<32x32xf32, #tpu.memory_space<vmem>>, %arg6: memref<1x32xf32, #tpu.memory_space<vmem>>, %arg7: memref<1x64xf32, #tpu.memory_space<vmem>>, %arg8: memref<1x32xf32, #tpu.memory_space<vmem>>, %arg9: memref<1x32xf32, #tpu.memory_space<vmem>>, %arg10: memref<1x32xf32, #tpu.memory_space<vmem>>, %arg11: memref<1x8x32xf32, #tpu.memory_space<vmem>>, %arg12: memref<8x32xf32, #tpu.memory_space<vmem>>) attributes {dimension_semantics = [#tpu.dimension_semantics<parallel>], iteration_bounds = array<i64: 2>, scalar_prefetch = 0 : i64, scratch_operands = 1 : i64, tpu.core_type = #tpu.core_type<tc>, window_params = [{transform_indices = @transform_0, window_bounds = array<i64: 1, 8, 32>}, {transform_indices = @transform_1, window_bounds = array<i64: 1, 16, 32>}, {pipeline_mode = #tpu.pipeline_mode<synchronous>, transform_indices = @transform_2, window_bounds = array<i64: 32, 32>}, {pipeline_mode = #tpu.pipeline_mode<synchronous>, transform_indices = @transform_3, window_bounds = array<i64: 32, 64>}, {pipeline_mode = #tpu.pipeline_mode<synchronous>, transform_indices = @transform_4, window_bounds = array<i64: 32, 32>}, {pipeline_mode = #tpu.pipeline_mode<synchronous>, transform_indices = @transform_5, window_bounds = array<i64: 1, 32>}, {pipeline_mode = #tpu.pipeline_mode<synchronous>, transform_indices = @transform_6, window_bounds = array<i64: 1, 64>}, {pipeline_mode = #tpu.pipeline_mode<synchronous>, transform_indices = @transform_7, window_bounds = array<i64: 1, 32>}, {pipeline_mode = #tpu.pipeline_mode<synchronous>, transform_indices = @transform_8, window_bounds = array<i64: 1, 32>}, {pipeline_mode = #tpu.pipeline_mode<synchronous>, transform_indices = @transform_9, window_bounds = array<i64: 1, 32>}, {transform_indices = @transform_10, window_bounds = array<i64: 1, 8, 32>}]} {
    %c0 = arith.constant 0 : index
    %c0_0 = arith.constant 0 : index
    %c0_1 = arith.constant 0 : index
    %0 = vector.load %arg1[%c0, %c0_0, %c0_1] : memref<1x8x32xf32, #tpu.memory_space<vmem>>, vector<1x8x32xf32>
    %1 = vector.shape_cast %0 : vector<1x8x32xf32> to vector<8x32xf32>
    %c0_2 = arith.constant 0 : index
    %c0_3 = arith.constant 0 : index
    %c0_4 = arith.constant 0 : index
    %2 = vector.load %arg2[%c0_2, %c0_3, %c0_4] : memref<1x16x32xf32, #tpu.memory_space<vmem>>, vector<1x16x32xf32>
    %3 = vector.shape_cast %2 : vector<1x16x32xf32> to vector<16x32xf32>
    %c0_5 = arith.constant 0 : index
    %c0_6 = arith.constant 0 : index
    %4 = vector.load %arg3[%c0_5, %c0_6] : memref<32x32xf32, #tpu.memory_space<vmem>>, vector<32x32xf32>
    %cst = arith.constant dense<0.000000e+00> : vector<8x32xf32>
    %5 = tpu.matmul %1, %4, %cst {dimension_numbers = #tpu.dot_dimension_numbers<[1], [0], [0], [1], [0, 0, 1, 1], [], []>} : vector<8x32xf32>, vector<32x32xf32>, vector<8x32xf32> -> vector<8x32xf32>
    %c0_7 = arith.constant 0 : index
    %c0_8 = arith.constant 0 : index
    %6 = vector.load %arg6[%c0_7, %c0_8] : memref<1x32xf32, #tpu.memory_space<vmem>>, vector<1x32xf32>
    %7 = vector.broadcast %6 : vector<1x32xf32> to vector<8x32xf32>
    %8 = arith.addf %5, %7 : vector<8x32xf32>
    %c0_9 = arith.constant 0 : index
    %c0_10 = arith.constant 0 : index
    %9 = vector.load %arg4[%c0_9, %c0_10] : memref<32x64xf32, #tpu.memory_space<vmem>>, vector<32x64xf32>
    %cst_11 = arith.constant dense<0.000000e+00> : vector<16x64xf32>
    %10 = tpu.matmul %3, %9, %cst_11 {dimension_numbers = #tpu.dot_dimension_numbers<[1], [0], [0], [1], [0, 0, 1, 1], [], []>} : vector<16x32xf32>, vector<32x64xf32>, vector<16x64xf32> -> vector<16x64xf32>
    %c0_12 = arith.constant 0 : index
    %c0_13 = arith.constant 0 : index
    %11 = vector.load %arg7[%c0_12, %c0_13] : memref<1x64xf32, #tpu.memory_space<vmem>>, vector<1x64xf32>
    %12 = vector.broadcast %11 : vector<1x64xf32> to vector<16x64xf32>
    %13 = arith.addf %10, %12 : vector<16x64xf32>
    %cst_14 = arith.constant 0.353553385 : f32
    %14 = vector.broadcast %cst_14 : f32 to vector<8x32xf32>
    %15 = arith.mulf %8, %14 : vector<8x32xf32>
    %16 = vector.extract_strided_slice %15 {offsets = [0, 0], sizes = [8, 8], strides = [1, 1]} : vector<8x32xf32> to vector<8x8xf32>
    %17 = vector.shape_cast %16 : vector<8x8xf32> to vector<1x8x8xf32>
    %18 = vector.extract_strided_slice %13 {offsets = [0, 0], sizes = [16, 8], strides = [1, 1]} : vector<16x64xf32> to vector<16x8xf32>
    %19 = vector.shape_cast %18 : vector<16x8xf32> to vector<1x16x8xf32>
    %20 = vector.extract_strided_slice %13 {offsets = [0, 32], sizes = [16, 8], strides = [1, 1]} : vector<16x64xf32> to vector<16x8xf32>
    %21 = vector.shape_cast %20 : vector<16x8xf32> to vector<1x16x8xf32>
    "tpu.trace_start"() <{level = 10 : i32, message = "bqd,bkd->bqk"}> : () -> ()
    %cst_15 = arith.constant dense<0.000000e+00> : vector<1x8x16xf32>
    %22 = tpu.matmul %17, %19, %cst_15 {dimension_numbers = #tpu.dot_dimension_numbers<[2], [2], [1], [1], [0, 0, 0, 1, 1, 1], [0], [0]>} : vector<1x8x8xf32>, vector<1x16x8xf32>, vector<1x8x16xf32> -> vector<1x8x16xf32>
    "tpu.trace_stop"() : () -> ()
    %cst_16 = arith.constant dense<0xFF800000> : vector<1x8xf32>
    %23 = vector.multi_reduction <maximumf>, %22, %cst_16 [2] : vector<1x8x16xf32> to vector<1x8xf32>
    %24 = vector.shape_cast %23 : vector<1x8xf32> to vector<1x8x1xf32>
    %25 = vector.broadcast %24 : vector<1x8x1xf32> to vector<1x8x16xf32>
    %26 = arith.subf %22, %25 : vector<1x8x16xf32>
    %27 = math.exp %26 : vector<1x8x16xf32>
    %cst_17 = arith.constant dense<0.000000e+00> : vector<1x8xf32>
    %28 = vector.multi_reduction <add>, %27, %cst_17 [2] : vector<1x8x16xf32> to vector<1x8xf32>
    %29 = vector.shape_cast %28 : vector<1x8xf32> to vector<1x8x1xf32>
    %30 = tpu.reciprocal %29 : vector<1x8x1xf32> -> vector<1x8x1xf32>
    %31 = vector.broadcast %30 : vector<1x8x1xf32> to vector<1x8x16xf32>
    %32 = arith.mulf %27, %31 : vector<1x8x16xf32>
    "tpu.trace_start"() <{level = 10 : i32, message = "bqk,bkd->bqd"}> : () -> ()
    %cst_18 = arith.constant dense<0.000000e+00> : vector<1x8x8xf32>
    %33 = tpu.matmul %32, %21, %cst_18 {dimension_numbers = #tpu.dot_dimension_numbers<[2], [1], [1], [2], [0, 0, 0, 1, 1, 2], [0], [0]>} : vector<1x8x16xf32>, vector<1x16x8xf32>, vector<1x8x8xf32> -> vector<1x8x8xf32>
    "tpu.trace_stop"() : () -> ()
    %34 = vector.shape_cast %33 : vector<1x8x8xf32> to vector<8x8xf32>
    %c0_19 = arith.constant 0 : index
    %c0_20 = arith.constant 0 : index
    %35 = vector.load %arg12[%c0_19, %c0_20] : memref<8x32xf32, #tpu.memory_space<vmem>>, vector<8x8xf32>
    tpu.vector_store %arg12[%c0_19, %c0_20], %34 {strides = array<i32>} : memref<8x32xf32, #tpu.memory_space<vmem>>, vector<8x8xf32>,
    %36 = vector.extract_strided_slice %15 {offsets = [0, 8], sizes = [8, 8], strides = [1, 1]} : vector<8x32xf32> to vector<8x8xf32>
    %37 = vector.shape_cast %36 : vector<8x8xf32> to vector<1x8x8xf32>
    %38 = vector.extract_strided_slice %13 {offsets = [0, 8], sizes = [16, 8], strides = [1, 1]} : vector<16x64xf32> to vector<16x8xf32>
    %39 = vector.shape_cast %38 : vector<16x8xf32> to vector<1x16x8xf32>
    %40 = vector.extract_strided_slice %13 {offsets = [0, 40], sizes = [16, 8], strides = [1, 1]} : vector<16x64xf32> to vector<16x8xf32>
    %41 = vector.shape_cast %40 : vector<16x8xf32> to vector<1x16x8xf32>
    "tpu.trace_start"() <{level = 10 : i32, message = "bqd,bkd->bqk"}> : () -> ()
    %cst_21 = arith.constant dense<0.000000e+00> : vector<1x8x16xf32>
    %42 = tpu.matmul %37, %39, %cst_21 {dimension_numbers = #tpu.dot_dimension_numbers<[2], [2], [1], [1], [0, 0, 0, 1, 1, 1], [0], [0]>} : vector<1x8x8xf32>, vector<1x16x8xf32>, vector<1x8x16xf32> -> vector<1x8x16xf32>
    "tpu.trace_stop"() : () -> ()
    %cst_22 = arith.constant dense<0xFF800000> : vector<1x8xf32>
    %43 = vector.multi_reduction <maximumf>, %42, %cst_22 [2] : vector<1x8x16xf32> to vector<1x8xf32>
    %44 = vector.shape_cast %43 : vector<1x8xf32> to vector<1x8x1xf32>
    %45 = vector.broadcast %44 : vector<1x8x1xf32> to vector<1x8x16xf32>
    %46 = arith.subf %42, %45 : vector<1x8x16xf32>
    %47 = math.exp %46 : vector<1x8x16xf32>
    %cst_23 = arith.constant dense<0.000000e+00> : vector<1x8xf32>
    %48 = vector.multi_reduction <add>, %47, %cst_23 [2] : vector<1x8x16xf32> to vector<1x8xf32>
    %49 = vector.shape_cast %48 : vector<1x8xf32> to vector<1x8x1xf32>
    %50 = tpu.reciprocal %49 : vector<1x8x1xf32> -> vector<1x8x1xf32>
    %51 = vector.broadcast %50 : vector<1x8x1xf32> to vector<1x8x16xf32>
    %52 = arith.mulf %47, %51 : vector<1x8x16xf32>
    "tpu.trace_start"() <{level = 10 : i32, message = "bqk,bkd->bqd"}> : () -> ()
    %cst_24 = arith.constant dense<0.000000e+00> : vector<1x8x8xf32>
    %53 = tpu.matmul %52, %41, %cst_24 {dimension_numbers = #tpu.dot_dimension_numbers<[2], [1], [1], [2], [0, 0, 0, 1, 1, 2], [0], [0]>} : vector<1x8x16xf32>, vector<1x16x8xf32>, vector<1x8x8xf32> -> vector<1x8x8xf32>
    "tpu.trace_stop"() : () -> ()
    %54 = vector.shape_cast %53 : vector<1x8x8xf32> to vector<8x8xf32>
    %c0_25 = arith.constant 0 : index
    %c8 = arith.constant 8 : index
    %55 = vector.load %arg12[%c0_25, %c8] : memref<8x32xf32, #tpu.memory_space<vmem>>, vector<8x8xf32>
    tpu.vector_store %arg12[%c0_25, %c8], %54 {strides = array<i32>} : memref<8x32xf32, #tpu.memory_space<vmem>>, vector<8x8xf32>,
    %56 = vector.extract_strided_slice %15 {offsets = [0, 16], sizes = [8, 8], strides = [1, 1]} : vector<8x32xf32> to vector<8x8xf32>
    %57 = vector.shape_cast %56 : vector<8x8xf32> to vector<1x8x8xf32>
    %58 = vector.extract_strided_slice %13 {offsets = [0, 16], sizes = [16, 8], strides = [1, 1]} : vector<16x64xf32> to vector<16x8xf32>
    %59 = vector.shape_cast %58 : vector<16x8xf32> to vector<1x16x8xf32>
    %60 = vector.extract_strided_slice %13 {offsets = [0, 48], sizes = [16, 8], strides = [1, 1]} : vector<16x64xf32> to vector<16x8xf32>
    %61 = vector.shape_cast %60 : vector<16x8xf32> to vector<1x16x8xf32>
    "tpu.trace_start"() <{level = 10 : i32, message = "bqd,bkd->bqk"}> : () -> ()
    %cst_26 = arith.constant dense<0.000000e+00> : vector<1x8x16xf32>
    %62 = tpu.matmul %57, %59, %cst_26 {dimension_numbers = #tpu.dot_dimension_numbers<[2], [2], [1], [1], [0, 0, 0, 1, 1, 1], [0], [0]>} : vector<1x8x8xf32>, vector<1x16x8xf32>, vector<1x8x16xf32> -> vector<1x8x16xf32>
    "tpu.trace_stop"() : () -> ()
    %cst_27 = arith.constant dense<0xFF800000> : vector<1x8xf32>
    %63 = vector.multi_reduction <maximumf>, %62, %cst_27 [2] : vector<1x8x16xf32> to vector<1x8xf32>
    %64 = vector.shape_cast %63 : vector<1x8xf32> to vector<1x8x1xf32>
    %65 = vector.broadcast %64 : vector<1x8x1xf32> to vector<1x8x16xf32>
    %66 = arith.subf %62, %65 : vector<1x8x16xf32>
    %67 = math.exp %66 : vector<1x8x16xf32>
    %cst_28 = arith.constant dense<0.000000e+00> : vector<1x8xf32>
    %68 = vector.multi_reduction <add>, %67, %cst_28 [2] : vector<1x8x16xf32> to vector<1x8xf32>
    %69 = vector.shape_cast %68 : vector<1x8xf32> to vector<1x8x1xf32>
    %70 = tpu.reciprocal %69 : vector<1x8x1xf32> -> vector<1x8x1xf32>
    %71 = vector.broadcast %70 : vector<1x8x1xf32> to vector<1x8x16xf32>
    %72 = arith.mulf %67, %71 : vector<1x8x16xf32>
    "tpu.trace_start"() <{level = 10 : i32, message = "bqk,bkd->bqd"}> : () -> ()
    %cst_29 = arith.constant dense<0.000000e+00> : vector<1x8x8xf32>
    %73 = tpu.matmul %72, %61, %cst_29 {dimension_numbers = #tpu.dot_dimension_numbers<[2], [1], [1], [2], [0, 0, 0, 1, 1, 2], [0], [0]>} : vector<1x8x16xf32>, vector<1x16x8xf32>, vector<1x8x8xf32> -> vector<1x8x8xf32>
    "tpu.trace_stop"() : () -> ()
    %74 = vector.shape_cast %73 : vector<1x8x8xf32> to vector<8x8xf32>
    %c0_30 = arith.constant 0 : index
    %c16 = arith.constant 16 : index
    %75 = vector.load %arg12[%c0_30, %c16] : memref<8x32xf32, #tpu.memory_space<vmem>>, vector<8x8xf32>
    tpu.vector_store %arg12[%c0_30, %c16], %74 {strides = array<i32>} : memref<8x32xf32, #tpu.memory_space<vmem>>, vector<8x8xf32>,
    %76 = vector.extract_strided_slice %15 {offsets = [0, 24], sizes = [8, 8], strides = [1, 1]} : vector<8x32xf32> to vector<8x8xf32>
    %77 = vector.shape_cast %76 : vector<8x8xf32> to vector<1x8x8xf32>
    %78 = vector.extract_strided_slice %13 {offsets = [0, 24], sizes = [16, 8], strides = [1, 1]} : vector<16x64xf32> to vector<16x8xf32>
    %79 = vector.shape_cast %78 : vector<16x8xf32> to vector<1x16x8xf32>
    %80 = vector.extract_strided_slice %13 {offsets = [0, 56], sizes = [16, 8], strides = [1, 1]} : vector<16x64xf32> to vector<16x8xf32>
    %81 = vector.shape_cast %80 : vector<16x8xf32> to vector<1x16x8xf32>
    "tpu.trace_start"() <{level = 10 : i32, message = "bqd,bkd->bqk"}> : () -> ()
    %cst_31 = arith.constant dense<0.000000e+00> : vector<1x8x16xf32>
    %82 = tpu.matmul %77, %79, %cst_31 {dimension_numbers = #tpu.dot_dimension_numbers<[2], [2], [1], [1], [0, 0, 0, 1, 1, 1], [0], [0]>} : vector<1x8x8xf32>, vector<1x16x8xf32>, vector<1x8x16xf32> -> vector<1x8x16xf32>
    "tpu.trace_stop"() : () -> ()
    %cst_32 = arith.constant dense<0xFF800000> : vector<1x8xf32>
    %83 = vector.multi_reduction <maximumf>, %82, %cst_32 [2] : vector<1x8x16xf32> to vector<1x8xf32>
    %84 = vector.shape_cast %83 : vector<1x8xf32> to vector<1x8x1xf32>
    %85 = vector.broadcast %84 : vector<1x8x1xf32> to vector<1x8x16xf32>
    %86 = arith.subf %82, %85 : vector<1x8x16xf32>
    %87 = math.exp %86 : vector<1x8x16xf32>
    %cst_33 = arith.constant dense<0.000000e+00> : vector<1x8xf32>
    %88 = vector.multi_reduction <add>, %87, %cst_33 [2] : vector<1x8x16xf32> to vector<1x8xf32>
    %89 = vector.shape_cast %88 : vector<1x8xf32> to vector<1x8x1xf32>
    %90 = tpu.reciprocal %89 : vector<1x8x1xf32> -> vector<1x8x1xf32>
    %91 = vector.broadcast %90 : vector<1x8x1xf32> to vector<1x8x16xf32>
    %92 = arith.mulf %87, %91 : vector<1x8x16xf32>
    "tpu.trace_start"() <{level = 10 : i32, message = "bqk,bkd->bqd"}> : () -> ()
    %cst_34 = arith.constant dense<0.000000e+00> : vector<1x8x8xf32>
    %93 = tpu.matmul %92, %81, %cst_34 {dimension_numbers = #tpu.dot_dimension_numbers<[2], [1], [1], [2], [0, 0, 0, 1, 1, 2], [0], [0]>} : vector<1x8x16xf32>, vector<1x16x8xf32>, vector<1x8x8xf32> -> vector<1x8x8xf32>
    "tpu.trace_stop"() : () -> ()
    %94 = vector.shape_cast %93 : vector<1x8x8xf32> to vector<8x8xf32>
    %c0_35 = arith.constant 0 : index
    %c24 = arith.constant 24 : index
    %95 = vector.load %arg12[%c0_35, %c24] : memref<8x32xf32, #tpu.memory_space<vmem>>, vector<8x8xf32>
    tpu.vector_store %arg12[%c0_35, %c24], %94 {strides = array<i32>} : memref<8x32xf32, #tpu.memory_space<vmem>>, vector<8x8xf32>,
    %c0_36 = arith.constant 0 : index
    %c0_37 = arith.constant 0 : index
    %96 = vector.load %arg12[%c0_36, %c0_37] : memref<8x32xf32, #tpu.memory_space<vmem>>, vector<8x32xf32>
    %c0_38 = arith.constant 0 : index
    %c0_39 = arith.constant 0 : index
    %97 = vector.load %arg5[%c0_38, %c0_39] : memref<32x32xf32, #tpu.memory_space<vmem>>, vector<32x32xf32>
    %cst_40 = arith.constant dense<0.000000e+00> : vector<8x32xf32>
    %98 = tpu.matmul %96, %97, %cst_40 {dimension_numbers = #tpu.dot_dimension_numbers<[1], [0], [0], [1], [0, 0, 1, 1], [], []>} : vector<8x32xf32>, vector<32x32xf32>, vector<8x32xf32> -> vector<8x32xf32>
    %c0_41 = arith.constant 0 : index
    %c0_42 = arith.constant 0 : index
    %99 = vector.load %arg8[%c0_41, %c0_42] : memref<1x32xf32, #tpu.memory_space<vmem>>, vector<1x32xf32>
    %100 = vector.broadcast %99 : vector<1x32xf32> to vector<8x32xf32>
    %101 = arith.addf %98, %100 : vector<8x32xf32>
    %102 = arith.addf %1, %101 : vector<8x32xf32>
    %cst_43 = arith.constant dense<0.000000e+00> : vector<8xf32>
    %103 = vector.multi_reduction <add>, %102, %cst_43 [1] : vector<8x32xf32> to vector<8xf32>
    %104 = vector.shape_cast %103 : vector<8xf32> to vector<8x1xf32>
    %cst_44 = arith.constant 3.200000e+01 : f32
    %105 = vector.broadcast %cst_44 : f32 to vector<8x1xf32>
    %106 = arith.divf %104, %105 : vector<8x1xf32>
    %107 = vector.broadcast %106 : vector<8x1xf32> to vector<8x32xf32>
    %108 = arith.subf %102, %107 : vector<8x32xf32>
    %109 = arith.mulf %108, %108 : vector<8x32xf32>
    %cst_45 = arith.constant dense<0.000000e+00> : vector<8xf32>
    %110 = vector.multi_reduction <add>, %109, %cst_45 [1] : vector<8x32xf32> to vector<8xf32>
    %111 = vector.shape_cast %110 : vector<8xf32> to vector<8x1xf32>
    %cst_46 = arith.constant 3.200000e+01 : f32
    %112 = vector.broadcast %cst_46 : f32 to vector<8x1xf32>
    %113 = arith.divf %111, %112 : vector<8x1xf32>
    %cst_47 = arith.constant 9.99999974E-6 : f32
    %114 = vector.broadcast %cst_47 : f32 to vector<8x1xf32>
    %115 = arith.addf %113, %114 : vector<8x1xf32>
    %116 = math.rsqrt %115 : vector<8x1xf32>
    %117 = vector.broadcast %116 : vector<8x1xf32> to vector<8x32xf32>
    %118 = arith.mulf %108, %117 : vector<8x32xf32>
    %c0_48 = arith.constant 0 : index
    %c0_49 = arith.constant 0 : index
    %119 = vector.load %arg9[%c0_48, %c0_49] : memref<1x32xf32, #tpu.memory_space<vmem>>, vector<1x32xf32>
    %120 = vector.broadcast %119 : vector<1x32xf32> to vector<8x32xf32>
    %121 = arith.mulf %118, %120 : vector<8x32xf32>
    %c0_50 = arith.constant 0 : index
    %c0_51 = arith.constant 0 : index
    %122 = vector.load %arg10[%c0_50, %c0_51] : memref<1x32xf32, #tpu.memory_space<vmem>>, vector<1x32xf32>
    %123 = vector.broadcast %122 : vector<1x32xf32> to vector<8x32xf32>
    %124 = arith.addf %121, %123 : vector<8x32xf32>
    %125 = vector.shape_cast %124 : vector<8x32xf32> to vector<1x8x32xf32>
    %c0_52 = arith.constant 0 : index
    %c0_53 = arith.constant 0 : index
    %c0_54 = arith.constant 0 : index
    %126 = vector.load %arg11[%c0_52, %c0_53, %c0_54] : memref<1x8x32xf32, #tpu.memory_space<vmem>>, vector<1x8x32xf32>
    tpu.vector_store %arg11[%c0_52, %c0_53, %c0_54], %125 {strides = array<i32>} : memref<1x8x32xf32, #tpu.memory_space<vmem>>, vector<1x8x32xf32>,
    return
  }
  func.func @transform_0(%arg0: i32) -> (i32, i32, i32) {
    %c0_i32 = arith.constant 0 : i32
    %c0_i32_0 = arith.constant 0 : i32
    %c0_i32_1 = arith.constant 0 : i32
    return %arg0, %c0_i32, %c0_i32_0 : i32, i32, i32
  }
  func.func @transform_1(%arg0: i32) -> (i32, i32, i32) {
    %c0_i32 = arith.constant 0 : i32
    %c0_i32_0 = arith.constant 0 : i32
    %c0_i32_1 = arith.constant 0 : i32
    return %arg0, %c0_i32, %c0_i32_0 : i32, i32, i32
  }
  func.func @transform_2(%arg0: i32) -> (i32, i32) {
    %c0_i32 = arith.constant 0 : i32
    %c0_i32_0 = arith.constant 0 : i32
    %c0_i32_1 = arith.constant 0 : i32
    return %c0_i32, %c0_i32_0 : i32, i32
  }
  func.func @transform_3(%arg0: i32) -> (i32, i32) {
    %c0_i32 = arith.constant 0 : i32
    %c0_i32_0 = arith.constant 0 : i32
    %c0_i32_1 = arith.constant 0 : i32
    return %c0_i32, %c0_i32_0 : i32, i32
  }
  func.func @transform_4(%arg0: i32) -> (i32, i32) {
    %c0_i32 = arith.constant 0 : i32
    %c0_i32_0 = arith.constant 0 : i32
    %c0_i32_1 = arith.constant 0 : i32
    return %c0_i32, %c0_i32_0 : i32, i32
  }
  func.func @transform_5(%arg0: i32) -> (i32, i32) {
    %c0_i32 = arith.constant 0 : i32
    %c0_i32_0 = arith.constant 0 : i32
    %c0_i32_1 = arith.constant 0 : i32
    return %c0_i32, %c0_i32_0 : i32, i32
  }
  func.func @transform_6(%arg0: i32) -> (i32, i32) {
    %c0_i32 = arith.constant 0 : i32
    %c0_i32_0 = arith.constant 0 : i32
    %c0_i32_1 = arith.constant 0 : i32
    return %c0_i32, %c0_i32_0 : i32, i32
  }
  func.func @transform_7(%arg0: i32) -> (i32, i32) {
    %c0_i32 = arith.constant 0 : i32
    %c0_i32_0 = arith.constant 0 : i32
    %c0_i32_1 = arith.constant 0 : i32
    return %c0_i32, %c0_i32_0 : i32, i32
  }
  func.func @transform_8(%arg0: i32) -> (i32, i32) {
    %c0_i32 = arith.constant 0 : i32
    %c0_i32_0 = arith.constant 0 : i32
    %c0_i32_1 = arith.constant 0 : i32
    return %c0_i32, %c0_i32_0 : i32, i32
  }
  func.func @transform_9(%arg0: i32) -> (i32, i32) {
    %c0_i32 = arith.constant 0 : i32
    %c0_i32_0 = arith.constant 0 : i32
    %c0_i32_1 = arith.constant 0 : i32
    return %c0_i32, %c0_i32_0 : i32, i32
  }
  func.func @transform_10(%arg0: i32) -> (i32, i32, i32) {
    %c0_i32 = arith.constant 0 : i32
    %c0_i32_0 = arith.constant 0 : i32
    %c0_i32_1 = arith.constant 0 : i32
    return %arg0, %c0_i32, %c0_i32_0 : i32, i32, i32
  }
}

</mosaic_0001>

<bundles_post_ra>
// kernel: tpu_custom_call.1
= control target key start
LH: loop header
LB: loop body
LE: loop exit
PB: predicated region body
PF: predicated region fallthrough
CT: control target
= control target key end

     0   :  { %s2703_s0 = inlined_call_operand.hbm [shape: f32[2,8,32], index: 0, kind: input, shape index: {}]   ;;  %s2704_s1 = inlined_call_operand.hbm [shape: f32[2,16,32], index: 1, kind: input, shape index: {}]   ;;  %s2705_s2 = inlined_call_operand.hbm [shape: f32[32,32], index: 2, kind: input, shape index: {}]   ;;  %s2706_s3 = inlined_call_operand.hbm [shape: f32[32,64], index: 3, kind: input, shape index: {}]   ;;  %s2707_s4 = inlined_call_operand.hbm [shape: f32[32,32], index: 4, kind: input, shape index: {}]   ;;  %s2708_s5 = inlined_call_operand.vmem [shape: f32[1,32], index: 5, kind: input, shape index: {}]   ;;  %s2709_s6 = inlined_call_operand.vmem [shape: f32[1,64], index: 6, kind: input, shape index: {}]   ;;  %s2710_s7 = inlined_call_operand.vmem [shape: f32[1,32], index: 7, kind: input, shape index: {}]   ;;  %s2711_s8 = inlined_call_operand.vmem [shape: f32[1,32], index: 8, kind: input, shape index: {}]   ;;  %s2712_s9 = inlined_call_operand.vmem [shape: f32[1,32], index: 9, kind: input, shape index: {}]   ;;  %s2713_s10 = inlined_call_operand.hbm [shape: f32[2,8,32], index: 10, kind: output, shape index: {}]  }
   0x1   :  { %2722 = sst [smem:[#allocation20_spill]] %s2703_s0 }
   0x2   :  { %2723 = sst [smem:[#allocation21_spill]] %s2705_s2 }
   0x3   :  { %2724 = sst [smem:[#allocation22_spill]] %s2712_s9 }
   0x4   :  { %2725 = sst [smem:[#allocation23_spill]] %s2713_s10 }
   0x5   :  { %15 = vsyncpa [#allocation4], 0 }
   0x6   :  { %17 = vsyncpa [#allocation4 + $0x1], 0 }
   0x7   :  { %18 = vsyncpa [#allocation7], 0 }
   0x8   :  { %20 = vsyncpa [#allocation7 + $0x1], 0 }
   0x9   :  { %21 = vsyncpa [#allocation10], 0 }
   0xa   :  { %22 = vsyncpa [#allocation5], 0 }
   0xb   :  { %24 = vsyncpa [#allocation5 + $0x1], 0  ;;  %s2272_s13 = smov 0   ;;  %s2274_s14 = smov 0  }
   0xc   :  { %s2276_s15 = smov 0   ;;  %s2278_s16 = smov 0  }
   0xd LB: > { %2726 = sst [smem:[#allocation18_spill]] %s2182_s13  ;;  %s2293_s17 = sadd.s32 4294967295, %s2194_s16   ;;  %s2194_s16 = sphi %s2278_s16, %s2758_s16   ;;  %s2190_s15 = sphi %s2276_s15, %s2757_s15   ;;  %s2186_s14 = sphi %s2274_s14, %s2756_s14   ;;  %s2182_s13 = sphi %s2272_s13, %s2755_s13  }
   0xe   : > { %s1597_s18 = sadd.s32 4294967294, %s2194_s16   ;;  %p50_p0 = scmp.ne.s32.totalorder %s2186_s14, %s2182_s13 }
   0xf   : > { %p2714_p1 = scmp.eq.s32.totalorder %s2293_s17, 0  ;;  %p274_p3 = scmp.eq.s32.totalorder %s1597_s18, 1 }
  0x10   : > { %p1598_p5 = scmp.ge.s32.totalorder %s2194_s16, 1  ;;  %p281_p7 = scmp.lt.s32.totalorder %s2194_s16, 3 }
  0x11   : > { %p2302_p4 = por %p2714_p1, %p50_p0  ;;  %p2307_p6 = por %p274_p3, %p50_p0 }
  0x12   : > { %p2312_p8 = pnand %p1598_p5, %p281_p7  ;;  %s2196_s22 = smov [#allocation8]  }
  0x13   : > { %s2727_s19 = scalar_select %p2302_p4, 1, 0 }
  0x14   : > { %s2728_s20 = scalar_select %p2307_p6, 1, 0 }
  0x15   : > { %s2730_s21 = scalar_select %p2312_p8, 1, 0 }
  0x16   : > { %2729 = sst [smem:[#allocation19_spill]] %s2728_s20  ;;  %s293_s23 = sshll.u32 %s2196_s22, 4  ;;  %s2316_s23 = int_to_ptr.vmem [resolvable:$true] %s293_s23 }
  0x17   : > { %p1840_p9 = pneg %p2312_p8  ;;  %s2197_s25 = smov [#allocation9]  }
  0x18   : > { %s306_s26 = sshll.u32 %s2197_s25, 4  ;;  %s2198_s27 = smov [#allocation11]   ;;  %s2327_s26 = int_to_ptr.vmem [resolvable:$true] %s306_s26 }
  0x19   : > { %p2323_p11 = pnand %p1840_p9, %p2714_p1  ;;  %s2329_s28 = sshll.u32 %s2198_s27, 4  ;;  %s320_s28 = int_to_ptr.vmem [resolvable:$true] %s2329_s28 }
  0x1a   : > { %s2732_s2 = sld [smem:[#allocation21_spill]] }
  0x1b   : > { %p2339_p13 = pneg %p2323_p11 }
  0x20   : > { %s1972_s11 = scalar_lea.hbm %s2732_s2, 512 }
  0x21   : > { %p1973_p12 = scmp.ne.s32.totalorder %s2732_s2, %s1972_s11  ;;  %p1979_p5 = scmp.lt.u32.totalorder %s1972_s11, %s2732_s2 }
  0x23   : > { %p1975_p0 = pnand %p2339_p13, %p1973_p12 }
  0x25   : > { %p1976_p3 = pneg %p1975_p0 }
  0x27   : > { %p1981_p7 = pnand %p1979_p5, %p1976_p3 }
  0x29   : > { %1984 = shalt.err (!%p1981_p7)
}
  0x2a   : > { %s1985_s29 = scalar_lea.vmem %s2316_s23, 512  ;;  %p1993_p2 = scmp.lt.s32.totalorder %s2316_s23, %s2316_s23 }
  0x2b   : > { %p1986_p9 = scmp.ne.s32.totalorder %s2316_s23, %s1985_s29  ;;  %p1994_p6 = scmp.lt.s32.totalorder %s1985_s29, %s1985_s29 }
  0x2d   : > { %p1988_p10 = pnand %p1986_p9, %p2339_p13  ;;  %p1995_p12 = por %p1994_p6, %p1993_p2 }
  0x2f   : > { %p1989_p1 = pneg %p1988_p10 }
  0x31   : > { %p1996_p0 = pnand %p1995_p12, %p1989_p1 }
  0x33   : > { %1999 = shalt.err (!%p1996_p0)
}
  0x34   : > { %s2720_s30 = smov 128   ;;  %s2721_s11 = smov 8  }
  0x35   : > { %1843 = dma.hbm_to_vmem [thread:$0]  (!%p2323_p11), %s2732_s2, 512, %s2316_s23, [#allocation7], %s2720_s30, %s2720_s30, %s2721_s11  }
  0x36   : > { %s2000_s29 = scalar_lea.hbm %s2706_s3, 512 }
  0x37   : > { %p2001_p1 = scmp.ne.s32.totalorder %s2706_s3, %s2000_s29  ;;  %p2007_p10 = scmp.lt.u32.totalorder %s2000_s29, %s2706_s3 }
  0x39   : > { %p2003_p2 = pnand %p2001_p1, %p2339_p13 }
  0x3b   : > { %p2004_p6 = pneg %p2003_p2 }
  0x3d   : > { %p2009_p3 = pnand %p2007_p10, %p2004_p6 }
  0x3f   : > { %2012 = shalt.err (!%p2009_p3)
}
  0x40   : > { %s2013_s23 = scalar_lea.vmem %s2327_s26, 512  ;;  %p2021_p12 = scmp.lt.s32.totalorder %s2327_s26, %s2327_s26 }
  0x41   : > { %p2014_p5 = scmp.ne.s32.totalorder %s2327_s26, %s2013_s23  ;;  %p2022_p0 = scmp.lt.s32.totalorder %s2013_s23, %s2013_s23 }
  0x43   : > { %p2016_p7 = pnand %p2014_p5, %p2339_p13  ;;  %p2023_p1 = por %p2022_p0, %p2021_p12 }
  0x45   : > { %p2017_p9 = pneg %p2016_p7 }
  0x47   : > { %p2024_p2 = pnand %p2023_p1, %p2017_p9 }
  0x49   : > { %2027 = shalt.err (!%p2024_p2)
}
  0x4a   : > { %1846 = dma.hbm_to_vmem [thread:$0]  (!%p2323_p11), %s2706_s3, 512, %s2327_s26, [#allocation10], %s2720_s30, %s2720_s30, %s2721_s11  }
  0x4b   : > { %s2028_s12 = scalar_lea.hbm %s2707_s4, 512 }
  0x4c   : > { %p2029_p6 = scmp.ne.s32.totalorder %s2707_s4, %s2028_s12  ;;  %p2035_p5 = scmp.lt.u32.totalorder %s2028_s12, %s2707_s4 }
  0x4e   : > { %p2031_p10 = pnand %p2029_p6, %p2339_p13 }
  0x50   : > { %p2032_p3 = pneg %p2031_p10 }
  0x52   : > { %p2037_p7 = pnand %p2035_p5, %p2032_p3 }
  0x54   : > { %2040 = shalt.err (!%p2037_p7)
}
  0x55   : > { %s2041_s23 = scalar_lea.vmem %s320_s28, 512  ;;  %p2049_p1 = scmp.lt.s32.totalorder %s320_s28, %s320_s28 }
  0x56   : > { %p2042_p9 = scmp.ne.s32.totalorder %s320_s28, %s2041_s23  ;;  %p2050_p2 = scmp.lt.s32.totalorder %s2041_s23, %s2041_s23 }
  0x58   : > { %p2044_p12 = pnand %p2042_p9, %p2339_p13  ;;  %p2051_p4 = por %p2050_p2, %p2049_p1 }
  0x5a   : > { %p2045_p0 = pneg %p2044_p12 }
  0x5c   : > { %p2052_p8 = pnand %p2051_p4, %p2045_p0 }
  0x5e   : > { %2055 = shalt.err (!%p2052_p8)
}
  0x5f   : > { %1849 = dma.hbm_to_vmem [thread:$0]  (!%p2323_p11), %s2707_s4, 512, %s320_s28, [#allocation10], %s2720_s30, %s2720_s30, %s2721_s11  }
  0x60   : > { %s2412_s22 = sadd.s32 1, %s2194_s16   ;;  %s37_s10 = sadd.s32 1, %s2190_s15 }
  0x61   : > { %s34_s24 = ssub.s32 %s2194_s16, %s2412_s22  ;;  %p44_p8 = scmp.ne.s32.totalorder %s2190_s15, %s2186_s14 }
  0x62   : > { %p35_p4 = scmp.eq.s32.totalorder %s34_s24, 0  ;;  %p45_p13 = scmp.eq.s32.totalorder %s2194_s16, 0 }
  0x63   : > { %p1864_p6 = scmp.lt.s32.totalorder %s2194_s16, 2  ;;  %p2734_p3 = scmp.eq.s32.totalorder %s2293_s17, 1 }
  0x64   : > { %s2422_s13 = scalar_select %p35_p4, %s2190_s15, %s37_s10  }
  0x65   : > { %p46_p10 = por %p45_p13, %p44_p8  ;;  %p2426_p5 = por %p2734_p3, %p44_p8 }
  0x66   : > { %s2431_s12 = sand.u32 1, %s2190_s15   ;;  %s1604_s28 = sshll.u32 %s2194_s16, 7 }
  0x67   : > { %s1603_s18 = sshll.u32 %s2431_s12, 3  ;;  %s2736_s0 = sld [smem:[#allocation20_spill]] }
  0x68   : > { %s352_s23 = scalar_lea.vmem [#allocation3], %s1603_s18  ;;  %p2440_p11 = pnand %p1864_p6, %p46_p10 }
  0x69   : > { %s359_s26 = sshll.u32 %s352_s23, 4  ;;  %s1605_s24 = sshll.u32 %s2431_s12, 4  ;;  %s2444_s26 = int_to_ptr.vmem [resolvable:$true] %s359_s26 }
  0x6a   : > { %s349_s10 = scalar_lea.sflag [#allocation4], %s2431_s12  ;;  %p2058_p9 = pneg %p2440_p11 }
  0x6d   : > { %s2438_s29 = scalar_lea.hbm %s2736_s0, %s1604_s28  ;;  %s2061_s25 = scalar_lea.hbm %s2736_s0, 256 }
  0x6e   : > { %s2056_s30 = scalar_lea.hbm %s2438_s29, 128  ;;  %p2062_p1 = scmp.lt.u32.totalorder %s2438_s29, %s2736_s0 }
  0x6f   : > { %p2057_p7 = scmp.ne.s32.totalorder %s2438_s29, %s2056_s30  ;;  %p2063_p2 = scmp.lt.u32.totalorder %s2061_s25, %s2056_s30 }
  0x70   : > { %p2065_p8 = scmp.lt.u32.totalorder %s2056_s30, %s2438_s29 }
  0x71   : > { %p2059_p12 = pnand %p2058_p9, %p2057_p7  ;;  %p2064_p4 = por %p2063_p2, %p2062_p1 }
  0x73   : > { %p2060_p0 = pneg %p2059_p12  ;;  %p2066_p13 = por %p2065_p8, %p2064_p4 }
  0x75   : > { %p2067_p6 = pnand %p2066_p13, %p2060_p0 }
  0x77   : > { %2070 = shalt.err (!%p2067_p6)
}
  0x78   : > { %s2071_s11 = scalar_lea.vmem %s2444_s26, 128  ;;  %s2201_s28 = smov [#allocation3]  }
  0x79   : > { %p2072_p10 = scmp.ne.s32.totalorder %s2444_s26, %s2071_s11  ;;  %s2076_s18 = sshll.u32 %s2201_s28, 4  ;;  %s2077_s18 = int_to_ptr.vmem [resolvable:$false] %s2076_s18 }
  0x7a   : > { %s2078_s27 = scalar_lea.vmem %s2077_s18, 256  ;;  %p2079_p12 = scmp.lt.s32.totalorder %s2444_s26, %s2077_s18 }
  0x7b   : > { %p2074_p3 = pnand %p2072_p10, %p2058_p9  ;;  %p2080_p1 = scmp.lt.s32.totalorder %s2078_s27, %s2071_s11 }
  0x7d   : > { %p2075_p7 = pneg %p2074_p3  ;;  %p2081_p2 = por %p2080_p1, %p2079_p12 }
  0x7f   : > { %p2082_p4 = pnand %p2081_p2, %p2075_p7 }
  0x81   : > { %2085 = shalt.err (!%p2082_p4)
}
  0x82   : > { %1853 = dma.hbm_to_vmem [thread:$0]  (!%p2440_p11), %s2438_s29, 128, %s2444_s26, %s349_s10  }
  0x83   : > { %s370_s30 = scalar_lea.vmem [#allocation6], %s1605_s24  ;;  %s366_s23 = sand.u32 1, %s2194_s16  }
  0x84   : > { %s377_s25 = sshll.u32 %s370_s30, 4  ;;  %s1644_s28 = sshll.u32 %s2194_s16, 8  ;;  %s2476_s25 = int_to_ptr.vmem [resolvable:$true] %s377_s25 }
  0x85   : > { %s2482_s27 = scalar_lea.hbm %s2704_s1, %s1644_s28  ;;  %s2484_s0 = scalar_lea.sflag [#allocation7], %s366_s23 }
  0x86   : > { %s2086_s2 = scalar_lea.hbm %s2482_s27, 256  ;;  %s2091_s26 = scalar_lea.hbm %s2704_s1, 512 }
  0x87   : > { %p2087_p0 = scmp.ne.s32.totalorder %s2482_s27, %s2086_s2  ;;  %p2092_p6 = scmp.lt.u32.totalorder %s2482_s27, %s2704_s1 }
  0x88   : > { %p2093_p10 = scmp.lt.u32.totalorder %s2091_s26, %s2086_s2  ;;  %p2095_p7 = scmp.lt.u32.totalorder %s2086_s2, %s2482_s27 }
  0x89   : > { %p2089_p8 = pnand %p2087_p0, %p2058_p9 }
  0x8a   : > { %p2094_p3 = por %p2093_p10, %p2092_p6 }
  0x8b   : > { %p2090_p13 = pneg %p2089_p8 }
  0x8c   : > { %p2096_p12 = por %p2095_p7, %p2094_p3 }
  0x8e   : > { %p2097_p1 = pnand %p2096_p12, %p2090_p13 }
  0x90   : > { %2100 = shalt.err (!%p2097_p1)
}
  0x91   : > { %s2101_s30 = scalar_lea.vmem %s2476_s25, 256  ;;  %s2202_s23 = smov [#allocation6]  }
  0x92   : > { %p2102_p2 = scmp.ne.s32.totalorder %s2476_s25, %s2101_s30  ;;  %s2106_s28 = sshll.u32 %s2202_s23, 4  ;;  %s2107_s28 = int_to_ptr.vmem [resolvable:$false] %s2106_s28 }
  0x93   : > { %s2108_s11 = scalar_lea.vmem %s2107_s28, 512  ;;  %p2109_p8 = scmp.lt.s32.totalorder %s2476_s25, %s2107_s28 }
  0x94   : > { %p2104_p4 = pnand %p2102_p2, %p2058_p9  ;;  %p2110_p6 = scmp.lt.s32.totalorder %s2108_s11, %s2101_s30 }
  0x96   : > { %p2105_p0 = pneg %p2104_p4  ;;  %p2111_p10 = por %p2110_p6, %p2109_p8 }
  0x98   : > { %p2112_p3 = pnand %p2111_p10, %p2105_p0 }
  0x9a   : > { %2115 = shalt.err (!%p2112_p3)
}
  0x9b   : > { %s2738_s2 = smov 8   ;;  %s2739_s18 = smov 128  }
  0x9c   : > { %1856 = dma.hbm_to_vmem [thread:$0]  (!%p2440_p11), %s2482_s27, 256, %s2476_s25, %s2484_s0, %s2739_s18, %s2739_s18, %s2738_s2  }
  0x9d   : > { %p2740_p9 = scmp.ne.s32.totalorder %s2730_s21, 0 }
  0x9e   : > { %s2516_s12 = sand.u32 (!%p2740_p9), 1, %s2186_s14   ;;  %p2741_p13 = scmp.ne.s32.totalorder (!%p2740_p9), %s2727_s19, 0 }
  0x9f   : > { %389 = sbr.rel (%p2740_p9) target bundleno = 2894 (0xb4e), region = 60  ;;  %s1609_s29 = sshll.u32 (!%p2740_p9), %s2516_s12, 3 }
  0xa0   : > { %s392_s26 = scalar_lea.sflag (!%p2740_p9), [#allocation4], %s2516_s12  ;;  %s2522_s9 = scalar_lea.vmem (!%p2740_p9), [#allocation3], %s1609_s29 }
  0xa6   : > { %2161 = dma.done.wait (%p2741_p13), %s392_s26, 128  }
  0xa7   : > { %2163 = vsyncadd (%p2741_p13), %s392_s26, 4294967168  ;;  %s400_s0 = sand.u32 1, %s2293_s17   ;;  %s1610_s21 = sshll.u32 %s2516_s12, 4 }
  0xa8   : > { %s401_s25 = scalar_lea.sflag [#allocation7], %s400_s0  ;;  %s2530_s27 = scalar_lea.vmem [#allocation6], %s1610_s21 }
  0xa9   : > { %2165 = dma.done.wait (%p2741_p13), %s401_s25, 256  }
  0xaa   : > { %2167 = vsyncadd (%p2741_p13), %s401_s25, 4294967040  ;;  %p2742_p11 = scmp.eq.s32.totalorder %s2293_s17, 0 }
  0xac   : > { %2169 = dma.done.wait (%p2742_p11), [#allocation7], 512   ;;  %p2743_p7 = pmov %p2742_p11 }
  0xae   : > { %2171 = vsyncadd (%p2743_p7), [#allocation7], 4294966784  ;;  %p2744_p12 = pmov %p2743_p7 }
  0xaf   : > { %p2745_p1 = pmov %p2743_p7 }
  0xb0   : > { %2173 = dma.done.wait (%p2744_p12), [#allocation10], 1024  }
  0xb1   : > { %2175 = vsyncadd (%p2745_p1), [#allocation10], 4294966272  ;;  %v2203_v0 = vmov 0.0|0.0   ;;  %vm2204_vm0 = vmmov 0   ;;  %v2205_v1 = vmov 0.0   ;;  %vm472_vm1 = vcmask 261120  }
  0xb2   : > { %1774 = vmatprep.subr.bf16.mxu0 %v2203_v0  ;;  %1693 = vmatprep.mubr.msk.f32.mxu0 %vm2204_vm0, %v2205_v1  ;;  %v546_v2 = vld [vmem:[#allocation9] sm:$0xff]  ;;  %v547_v3 = vld [vmem:[#allocation9 + $0x8] sm:$0xff]  ;;  %v548_v4 = vld [vmem:[#allocation9 + $0x10] sm:$0xff]  ;;  %vm639_vm2 = vcmask 64512   ;;  %s2206_s23 = smov 96   ;;  %s2207_s28 = smov 120  }
  0xb3   : > { %v1780_v5 = vpack.c.bf16 %v547_v3, %v546_v2  ;;  %v549_v6 = vld [vmem:[#allocation9 + $0x18] sm:$0xff]  ;;  %v459_v7 = vld [vmem:[%s2530_s27] sm:$0xff]  ;;  %v462_v10 = vld [vmem:[#allocation8 + $0x8] sm:$0xff]  ;;  %s2208_s11 = smov 112   ;;  %vm719_vm4 = vcmask 130048   ;;  %s2209_s2 = smov 80  }
  0xb4   : > { %v461_v8 = vld [vmem:[#allocation8] sm:$0xff]  ;;  %v1784_v9 = vpack.c.bf16 %v549_v6, %v548_v4  ;;  %1704 = vmatprep.mubr.msk.f32.mxu1 %vm472_vm1, %v459_v7  ;;  %v463_v11 = vld [vmem:[#allocation8 + $0x10] sm:$0xff]  ;;  %v464_v13 = vld [vmem:[#allocation8 + $0x18] sm:$0xff]  ;;  %s2210_s18 = smov 88   ;;  %s2211_s26 = smov 104   ;;  %vm987_vm5 = vcmask 130112  }
  0xb5   : > { %1781 = vmatprep.subr.bf16.mxu1 %v1780_v5  ;;  %v1775_v12 = vpack.c.bf16 %v462_v10, %v461_v8  ;;  %v1778_v14 = vpack.c.bf16 %v464_v13, %v463_v11  ;;  %v460_v15 = vld [vmem:[%s2530_s27 + $0x8] sm:$0xff]  ;;  %vm2571_vm3 = vmpackc.low %vm639_vm2, %vm639_vm2  ;;  %s2213_s0 = smov 16   ;;  %s2214_s21 = smov 8   ;;  %vm1165_vm6 = vcmask 195712   ;;  %vm1343_vm7 = vcmask 261312  }
  0xb6   : > { %1783 = vmatpush3.bf16.msra.mxu1 %v1780_v5  ;;  %v2552_v16 = vld [vmem:[%s2522_s9] sm:$0xff]  ;;  %v1617_v17 = vld [vmem:[%s2709_s6] ss:$0 sm:$0xff]  ;;  %s2212_s9 = smov 72   ;;  %s2215_s25 = smov 24  }
  0xb7   : > { %1785 = vmatprep.subr.bf16.mxu1 %v1784_v9  ;;  %1776 = vmatpush3.bf16.msra.mxu0 %v1775_v12  ;;  %v1615_v21 = vld [vmem:[%s2708_s5] ss:$0 sm:$0xff] }
  0xb8   : > { %1777 = vmatprep.subr.bf16.mxu0 %v2203_v0 }
  0xba   : > { %1787 = vmatpush3.bf16.msra.mxu1 %v1784_v9 }
  0xbb   : > { %1779 = vmatpush3.bf16.msra.mxu0 %v1778_v14  ;;  %1792 = vmatprep.subr.bf16.mxu1 %v2203_v0 }
  0xbc   : > { %1788 = vmatprep.subr.bf16.mxu0 %v2203_v0 }
  0xbd   : > { %1705 = vmatmul.mubr.msk.f32.vlgmr.msra.gmra.mrb[0].mxu1 %vm472_vm1, %v460_v15 }
  0xbe   : > { %1694 = vmatmul.mubr.msk.f32.vlgmr.msra.gmra.mrb[0].mxu0 %vm472_vm1, %v2552_v16  ;;  %1718 = vmatprep.mubr.msk.f32.mxu1 %vm2204_vm0, %v2205_v1 }
  0xbf   : > { %1711 = vmatprep.mubr.msk.f32.mxu0 %vm2204_vm0, %v2205_v1 }
 0x190   : > { %v1706_v18 = vpop.f32.mrb[0].mxu1 }
 0x191   : > { %v635_v19 = vadd.f32 %v1706_v18, %v1617_v17  ;;  %v629_v20 = vpop.f32.mrb[1].mxu1  ;;  %v542_v22 = vpop.f32.mrb[0].mxu0 }
 0x192   : > { %v630_v23 = vadd.f32 %v1617_v17, %v629_v20  ;;  %v1695_v24 = vpop.f32.mrb[1].mxu0  ;;  %v543_v28 = vadd.f32 %v1615_v21, %v542_v22 }
 0x194   : > { %v2575_v26 = vpack.i.bf16 %v635_v19, %v630_v23  ;;  %v1789_v27 = vpack.c.bf16 %v635_v19, %v630_v23  ;;  %v2581_v29 = vmul.f32 0.35355338, %v543_v28 }
 0x196   : > { %1920 = vrot.lane.b32.xlu1 %v2575_v26, %s2206_s23  ;;  %1791 = vmatpush3.bf16.xpose.msk.msra.mxu0 %vm2571_vm3, %v1789_v27 }
 0x197   : > { %1802 = vmatprep.subr.bf16.mxu0 %v2203_v0 }
 0x19a   : > { %1925 = vrot.lane.b32.xlu1 %v2575_v26, %s2207_s28 }
 0x19d   : > { %1712 = vmatmul.mubr.msk.f32.vlgmr.msra.gmra.mrb[2].mxu0 %vm639_vm2, %v2581_v29 }
 0x19e   : > { %1930 = vrot.lane.b32.xlu1 %v2575_v26, %s2208_s11  ;;  %1739 = vmatprep.mubr.msk.f32.mxu0 %vm2204_vm0, %v2205_v1 }
 0x1a2   : > { %989 = vrot.lane.b32.xlu1 %v2581_v29, %s2208_s11  ;;  %s1641_s11 = sshll.u32 %s2293_s17, 7  ;;  %s2216_s17 = smov [#allocation12]  }
 0x208   : > { %v1921_v30 = vpop.permute.xlu1 %1920 }
 0x209   : > { %v1923_v31 = vunpack.i.h.bf16 %v1921_v30  ;;  %v1922_v32 = vunpack.i.l.bf16 %v1921_v30 }
 0x20b   : > { %v1793_v33 = vpack.c.bf16 %v1923_v31, %v1922_v32 }
 0x20c   : > { %v1926_v34 = vpop.permute.xlu1 %1925 }
 0x20d   : > { %1794 = vmatpush3.bf16.msra.mxu1 %v1793_v33  ;;  %v1928_v52 = vunpack.i.h.bf16 %v1926_v34  ;;  %v1927_v53 = vunpack.i.l.bf16 %v1926_v34 }
 0x20e   : > { %1795 = vmatprep.subr.bf16.mxu1 %v2203_v0 }
 0x20f   : > { %v1796_v56 = vpack.c.bf16 %v1928_v52, %v1927_v53  ;;  %v1346_v52 = vld [vmem:[#allocation11] sm:$0xff]  ;;  %v1347_v53 = vld [vmem:[#allocation11 + $0x8] sm:$0xff] }
 0x210   : > { %v1931_v35 = vpop.permute.xlu1 %1930 }
 0x211   : > { %v1933_v36 = vunpack.i.h.bf16 %v1931_v35  ;;  %v1932_v37 = vunpack.i.l.bf16 %v1931_v35 }
 0x213   : > { %v1803_v38 = vpack.c.bf16 %v1933_v36, %v1932_v37 }
 0x214   : > { %v990_v39 = vpop.permute.xlu1 %989 }
 0x215   : > { %1805 = vmatpush3.bf16.xpose.msk.msra.mxu0 %vm2571_vm3, %v1803_v38 }
 0x216   : > { %1813 = vmatprep.subr.bf16.mxu0 %v2203_v0 }
 0x21c   : > { %1740 = vmatmul.mubr.msk.f32.vlgmr.msra.gmra.mrb[4].mxu0 %vm639_vm2, %v990_v39 }
 0x21d   : > { %1760 = vmatprep.mubr.msk.f32.mxu0 %vm2204_vm0, %v2205_v1 }
 0x270   : > { %v715_v40 = vpop.f32.mrb[2].mxu0 }
 0x271   : > { %v1713_v41 = vpop.f32.mrb[3].mxu0  ;;  %v720_v42 = vsel %vm719_vm4, %v715_v40, -inf }
 0x272   : > { %721 = vmax.xlane.f32.xlu0 %v720_v42 }
 0x2ef   : > { %v1067_v43 = vpop.f32.mrb[4].mxu0 }
 0x2f0   : > { %v1741_v44 = vpop.f32.mrb[5].mxu0  ;;  %v1071_v50 = vsel %vm719_vm4, %v1067_v43, -inf }
 0x2ff   : > { %v722_v45 = vpop.xlane.xlu0 %721 }
 0x300   : > { %v723_v46 = vsub.f32 %v715_v40, %v722_v45 }
 0x302   : > { %v724_v47 = vmul.f32 1.442695, %v723_v46 }
 0x304   : > { %1954 = vpow2.f32 %v724_v47 }
 0x30e   : > { %v1955_v48 = vpop.eup %1954 }
 0x30f   : > { %v726_v49 = vsel %vm719_vm4, %v1955_v48, 0.0 }
 0x310   : > { %727 = vadd.xlane.f32.xlu0 %v726_v49 }
 0x326   : > { %811 = vrot.lane.b32.xlu0 %v2581_v29, %s2207_s28  ;;  %s2748_s28 = sld [smem:[#allocation22_spill]] }
 0x345   : > { %1072 = vmax.xlane.f32.xlu0 %v1071_v50 }
 0x35b   : > { %1940 = vrot.lane.b32.xlu0 %v2575_v26, %s2209_s2  ;;  %s457_s2 = scalar_lea.vmem [#allocation12], %s1609_s29  ;;  %s2120_s29 = sshll.u32 %s2216_s17, 4  ;;  %s2121_s29 = int_to_ptr.vmem [resolvable:$false] %s2120_s29 }
 0x35c   : > { %s2122_s19 = scalar_lea.vmem %s2121_s29, 256 }
 0x39d   : > { %v728_v51 = vpop.xlane.xlu0 %727 }
 0x39e   : > { %1956 = vrcp.f32 %v728_v51 }
 0x3a1   : > { %v812_v57 = vpop.permute.xlu0 %811 }
 0x3a8   : > { %v1957_v54 = vpop.eup %1956 }
 0x3a9   : > { %v730_v55 = vmul.f32 %v1957_v54, %v1955_v48  ;;  %v1817_v54 = vpack.c.bf16 %v1347_v53, %v1346_v52 }
 0x3ab   : > { %1719 = vmatmul.mubr.msk.f32.vlgmr.msra.gmra.mrb[2].mxu1 %vm719_vm4, %v730_v55  ;;  %v1348_v55 = vld [vmem:[#allocation11 + $0x10] sm:$0xff] }
 0x3ac   : > { %1798 = vmatpush3.bf16.xpose.msk.msra.mxu1 %vm2571_vm3, %v1796_v56  ;;  %1725 = vmatprep.mubr.msk.f32.mxu1 %vm2204_vm0, %v2205_v1  ;;  %v1349_v56 = vld [vmem:[#allocation11 + $0x18] sm:$0xff] }
 0x3ad   : > { %1799 = vmatprep.subr.bf16.mxu1 %v2203_v0 }
 0x3b3   : > { %1726 = vmatmul.mubr.msk.f32.vlgmr.msra.gmra.mrb[4].mxu1 %vm639_vm2, %v812_v57  ;;  %v1820_v57 = vpack.c.bf16 %v1349_v56, %v1348_v55 }
 0x3b4   : > { %1732 = vmatprep.mubr.msk.f32.mxu1 %vm2204_vm0, %v2205_v1 }
 0x3d2   : > { %v1073_v58 = vpop.xlane.xlu0 %1072 }
 0x3d3   : > { %v1074_v59 = vsub.f32 %v1067_v43, %v1073_v58 }
 0x3d5   : > { %v1075_v60 = vmul.f32 1.442695, %v1074_v59 }
 0x3d6   : > { %v1941_v18 = vpop.permute.xlu0 %1940 }
 0x3d7   : > { %1958 = vpow2.f32 %v1075_v60  ;;  %v1943_v19 = vunpack.i.h.bf16 %v1941_v18  ;;  %v1942_v20 = vunpack.i.l.bf16 %v1941_v18 }
 0x3d9   : > { %v1807_v24 = vpack.c.bf16 %v1943_v19, %v1942_v20 }
 0x3e1   : > { %v1959_v4 = vpop.eup %1958 }
 0x3e2   : > { %v1077_v5 = vsel %vm719_vm4, %v1959_v4, 0.0 }
 0x47e   : > { %v806_v61 = vpop.f32.mrb[2].mxu1 }
 0x47f   : > { %810 = vst.msk [vmem:[#allocation2] sm:$0xff] %vm639_vm2, %v806_v61  ;;  %v1720_v62 = vpop.f32.mrb[3].mxu1 }
 0x486   : > { %v889_v63 = vpop.f32.mrb[4].mxu1 }
 0x487   : > { %v1727_v2 = vpop.f32.mrb[5].mxu1  ;;  %v893_v3 = vsel %vm719_vm4, %v889_v63, -inf }
 0x488   : > { %894 = vmax.xlane.f32.xlu1 %v893_v3 }
 0x48c   : > { %1078 = vadd.xlane.f32.xlu1 %v1077_v5 }
 0x49d   : > { %1935 = vrot.lane.b32.xlu1 %v2575_v26, %s2210_s18  ;;  %s1476_s18 = sshll.u32 %s457_s2, 4  ;;  %s2660_s18 = int_to_ptr.vmem [resolvable:$true] %s1476_s18 }
 0x49e   : > { %s2116_s27 = scalar_lea.vmem %s2660_s18, 128  ;;  %p2123_p8 = scmp.lt.s32.totalorder %s2660_s18, %s2121_s29 }
 0x49f   : > { %p2117_p2 = scmp.ne.s32.totalorder %s2660_s18, %s2116_s27  ;;  %p2124_p6 = scmp.lt.s32.totalorder %s2122_s19, %s2116_s27 }
 0x4a1   : > { %p2118_p4 = pnand %p2117_p2, %p2426_p5  ;;  %p2125_p10 = por %p2124_p6, %p2123_p8 }
 0x4a3   : > { %p2119_p0 = pneg %p2118_p4 }
 0x4a5   : > { %p2126_p3 = pnand %p2125_p10, %p2119_p0 }
 0x515   : > { %v895_v6 = vpop.xlane.xlu1 %894 }
 0x516   : > { %v896_v7 = vsub.f32 %v889_v63, %v895_v6 }
 0x518   : > { %v897_v8 = vmul.f32 1.442695, %v896_v7 }
 0x519   : > { %v1079_v9 = vpop.xlane.xlu1 %1078 }
 0x51a   : > { %1960 = vpow2.f32 %v897_v8 }
 0x51d   : > { %v1936_v10 = vpop.permute.xlu1 %1935 }
 0x51e   : > { %v1938_v11 = vunpack.i.h.bf16 %v1936_v10  ;;  %v1937_v12 = vunpack.i.l.bf16 %v1936_v10 }
 0x520   : > { %v1800_v13 = vpack.c.bf16 %v1938_v11, %v1937_v12 }
 0x522   : > { %1801 = vmatpush3.bf16.msra.mxu1 %v1800_v13 }
 0x523   : > { %1806 = vmatprep.subr.bf16.mxu1 %v2203_v0 }
 0x524   : > { %v1961_v14 = vpop.eup %1960 }
 0x525   : > { %v899_v15 = vsel %vm719_vm4, %v1961_v14, 0.0 }
 0x526   : > { %900 = vadd.xlane.f32.xlu1 %v899_v15 }
 0x537   : > { %1945 = vrot.lane.b32.xlu1 %v2575_v26, %s2211_s26 }
 0x53b   : > { %1167 = vrot.lane.b32.xlu1 %v2581_v29, %s2211_s26 }
 0x5b3   : > { %v901_v17 = vpop.xlane.xlu1 %900 }
 0x5b4   : > { %1962 = vrcp.f32 %v901_v17 }
 0x5b5   : > { %1964 = vrcp.f32 %v1079_v9 }
 0x5b7   : > { %v1946_v27 = vpop.permute.xlu1 %1945 }
 0x5b8   : > { %v1948_v29 = vunpack.i.h.bf16 %v1946_v27  ;;  %v1947_v30 = vunpack.i.l.bf16 %v1946_v27 }
 0x5ba   : > { %v1810_v31 = vpack.c.bf16 %v1948_v29, %v1947_v30 }
 0x5bb   : > { %v1168_v32 = vpop.permute.xlu1 %1167 }
 0x5be   : > { %v1963_v21 = vpop.eup %1962 }
 0x5bf   : > { %v903_v22 = vmul.f32 %v1963_v21, %v1961_v14  ;;  %v1965_v23 = vpop.eup %1964  ;;  %v1639_v14 = vld [vmem:[%s2748_s28] ss:$0 sm:$0xff] }
 0x5c0   : > { %v1081_v28 = vmul.f32 %v1965_v23, %v1959_v4 }
 0x5c1   : > { %1733 = vmatmul.mubr.msk.f32.vlgmr.msra.gmra.mrb[6].mxu1 %vm719_vm4, %v903_v22 }
 0x5c2   : > { %1808 = vmatpush3.bf16.msra.mxu1 %v1807_v24  ;;  %1746 = vmatprep.mubr.msk.f32.mxu1 %vm2204_vm0, %v2205_v1 }
 0x5c3   : > { %1809 = vmatprep.subr.bf16.mxu1 %v2203_v0 }
 0x5c5   : > { %1747 = vmatmul.mubr.msk.f32.vlgmr.msra.gmra.mrb[8].mxu1 %vm719_vm4, %v1081_v28 }
 0x5c6   : > { %1753 = vmatprep.mubr.msk.f32.mxu1 %vm2204_vm0, %v2205_v1 }
 0x5cb   : > { %1812 = vmatpush3.bf16.xpose.msk.msra.mxu1 %vm2571_vm3, %v1810_v31 }
 0x5d2   : > { %1754 = vmatmul.mubr.msk.f32.vlgmr.msra.gmra.mrb[10].mxu1 %vm639_vm2, %v1168_v32 }
 0x694   : > { %v979_v33 = vpop.f32.mrb[6].mxu1 }
 0x695   : > { %v1734_v34 = vpop.f32.mrb[7].mxu1 }
 0x698   : > { %v1157_v35 = vpop.f32.mrb[8].mxu1 }
 0x699   : > { %v1748_v36 = vpop.f32.mrb[9].mxu1 }
 0x6a5   : > { %v1245_v37 = vpop.f32.mrb[10].mxu1 }
 0x6a6   : > { %v1755_v38 = vpop.f32.mrb[11].mxu1  ;;  %v1249_v39 = vsel %vm719_vm4, %v1245_v37, -inf }
 0x6a7   : > { %1250 = vmax.xlane.f32.xlu0 %v1249_v39 }
 0x6bd   : > { %1950 = vrot.lane.b32.xlu0 %v2575_v26, %s2212_s9 }
 0x6c1   : > { %1162 = vrot.lane.b32.xlu0 %v1157_v35, %s2213_s0  ;;  %s2749_s0 = sld [smem:[#allocation23_spill]] }
 0x734   : > { %v1251_v40 = vpop.xlane.xlu0 %1250 }
 0x735   : > { %v1252_v25 = vsub.f32 %v1245_v37, %v1251_v40 }
 0x737   : > { %v1253_v41 = vmul.f32 1.442695, %v1252_v25 }
 0x738   : > { %v1951_v42 = vpop.permute.xlu0 %1950 }
 0x739   : > { %1966 = vpow2.f32 %v1253_v41  ;;  %v1953_v43 = vunpack.i.h.bf16 %v1951_v42  ;;  %v1952_v44 = vunpack.i.l.bf16 %v1951_v42 }
 0x73b   : > { %v1814_v45 = vpack.c.bf16 %v1953_v43, %v1952_v44 }
 0x73c   : > { %v1163_v49 = vpop.permute.xlu0 %1162 }
 0x73d   : > { %1815 = vmatpush3.bf16.msra.mxu0 %v1814_v45 }
 0x73e   : > { %1816 = vmatprep.subr.bf16.mxu0 %v2203_v0 }
 0x743   : > { %v1967_v46 = vpop.eup %1966 }
 0x744   : > { %v1255_v47 = vsel %vm719_vm4, %v1967_v46, 0.0 }
 0x745   : > { %1256 = vadd.xlane.f32.xlu1 %v1255_v47 }
 0x756   : > { %984 = vrot.lane.b32.xlu1 %v979_v33, %s2214_s21  ;;  %s2658_s21 = scalar_lea.hbm %s2749_s0, %s1641_s11 }
 0x7d2   : > { %v1257_v26 = vpop.xlane.xlu1 %1256 }
 0x7d3   : > { %1968 = vrcp.f32 %v1257_v26 }
 0x7d6   : > { %v985_v48 = vpop.permute.xlu1 %984 }
 0x7d7   : > { %988 = vst.msk [vmem:[#allocation2] sm:$0xff] %vm987_vm5, %v985_v48 }
 0x7d8   : > { %1166 = vst.msk [vmem:[#allocation2] sm:$0xff] %vm1165_vm6, %v1163_v49 }
 0x7dd   : > { %v1969_v50 = vpop.eup %1968 }
 0x7de   : > { %v1259_v51 = vmul.f32 %v1969_v50, %v1967_v46 }
 0x7e0   : > { %1761 = vmatmul.mubr.msk.f32.vlgmr.msra.gmra.mrb[6].mxu0 %vm719_vm4, %v1259_v51 }
 0x7e1   : > { %1771 = vmatprep.mubr.msk.f32.mxu0 %vm2204_vm0, %v2205_v1  ;;  %1818 = vmatpush3.bf16.msra.mxu0 %v1817_v54  ;;  %v1636_v1 = vld [vmem:[%s2710_s7] ss:$0 sm:$0xff] }
 0x7e2   : > { %1819 = vmatprep.subr.bf16.mxu0 %v2203_v0 }
 0x7e5   : > { %1821 = vmatpush3.bf16.msra.mxu0 %v1820_v57 }
 0x8b3   : > { %v1335_v58 = vpop.f32.mrb[6].mxu0 }
 0x8b4   : > { %1340 = vrot.lane.b32.xlu1 %v1335_v58, %s2215_s25  ;;  %v1762_v59 = vpop.f32.mrb[7].mxu0  ;;  %s1463_s25 = scalar_lea.sflag [#allocation5], %s2516_s12 }
 0x926   : > { %v1341_v60 = vpop.permute.xlu1 %1340 }
 0x927   : > { %1344 = vst.msk [vmem:[#allocation2] sm:$0xff] %vm1343_vm7, %v1341_v60 }
 0x92e   : > { %v1345_v61 = vld [vmem:[#allocation2] sm:$0xff] }
 0x92f   : > { %1772 = vmatmul.mubr.msk.f32.vlgmr.msra.gmra.mrb[8].mxu0 %vm472_vm1, %v1345_v61 }
 0xa02   : > { %v1426_v62 = vpop.f32.mrb[8].mxu0 }
 0xa03   : > { %v1427_v63 = vadd.f32 %v1636_v1, %v1426_v62  ;;  %v1773_v2 = vpop.f32.mrb[9].mxu0 }
 0xa05   : > { %v1430_v0 = vadd.f32 %v1427_v63, %v2552_v16  ;;  %v1638_v16 = vld [vmem:[%s2711_s8] ss:$0 sm:$0xff] }
 0xa07   : > { %v1431_v3 = vsel %vm472_vm1, %v1430_v0, 0.0 }
 0xa08   : > { %1432 = vadd.xlane.f32.xlu0 %v1431_v3 }
 0xa95   : > { %v1433_v4 = vpop.xlane.xlu0 %1432 }
 0xa96   : > { %v1435_v5 = vmul.f32 0.03125, %v1433_v4 }
 0xa98   : > { %v1436_v6 = vsub.f32 %v1430_v0, %v1435_v5 }
 0xa9a   : > { %v1437_v7 = vmul.f32 %v1436_v6, %v1436_v6 }
 0xa9c   : > { %v1438_v8 = vsel %vm472_vm1, %v1437_v7, 0.0 }
 0xa9d   : > { %1439 = vadd.xlane.f32.xlu1 %v1438_v8 }
 0xb2a   : > { %v1440_v9 = vpop.xlane.xlu1 %1439 }
 0xb2b   : > { %v1441_v10 = vmul.f32 0.03125, %v1440_v9 }
 0xb2d   : > { %v1442_v11 = vadd.f32 1e-05, %v1441_v10 }
 0xb2f   : > { %1970 = vrsqrt.f32 %v1442_v11 }
 0xb39   : > { %v1971_v12 = vpop.eup %1970 }
 0xb3a   : > { %v1444_v13 = vmul.f32 %v1971_v12, %v1436_v6 }
 0xb3c   : > { %v1452_v15 = vmul.f32 %v1638_v16, %v1444_v13 }
 0xb3e   : > { %v1460_v17 = vadd.f32 %v1639_v14, %v1452_v15 }
 0xb40   : > { %1461 = vst.msk [vmem:[%s457_s2] sm:$0xff] %vm472_vm1, %v1460_v17 }
 0xb41   : > { %2129 = shalt.err (!%p2126_p3)
}
 0xb42   : > { %s2130_s12 = scalar_lea.hbm %s2658_s21, 128  ;;  %s2134_s30 = scalar_lea.hbm %s2749_s0, 256 }
 0xb43   : > { %p2131_p9 = scmp.ne.s32.totalorder %s2658_s21, %s2130_s12  ;;  %p2135_p7 = scmp.lt.u32.totalorder %s2658_s21, %s2749_s0 }
 0xb44   : > { %p2136_p12 = scmp.lt.u32.totalorder %s2134_s30, %s2130_s12  ;;  %p2138_p2 = scmp.lt.u32.totalorder %s2130_s12, %s2658_s21 }
 0xb45   : > { %p2132_p13 = pnand %p2131_p9, %p2426_p5 }
 0xb46   : > { %p2137_p1 = por %p2136_p12, %p2135_p7 }
 0xb47   : > { %p2133_p11 = pneg %p2132_p13 }
 0xb48   : > { %p2139_p4 = por %p2138_p2, %p2137_p1 }
 0xb4a   : > { %p2140_p0 = pnand %p2139_p4, %p2133_p11 }
 0xb4c   : > { %2143 = shalt.err (!%p2140_p0)
}
 0xb4d   : > { %1838 = dma.vmem_to_hbm [thread:$0]  (%p2426_p5), %s2660_s18, 128, %s2658_s21, %s1463_s25  }
 0xb4e PF: > { %s2750_s11 = sld [smem:[#allocation18_spill]]  ;;  %s2751_s2 = sld [smem:[#allocation19_spill]] }
 0xb4f   : > { %p2753_p6 = scmp.ge.s32.totalorder %s2194_s16, 2 }
 0xb54   : > { %s1488_s26 = sand.u32 1, %s2750_s11   ;;  %p2752_p8 = scmp.ne.s32.totalorder %s2751_s2, 0 }
 0xb55   : > { %s1489_s9 = scalar_lea.sflag [#allocation5], %s1488_s26 }
 0xb56   : > { %p1858_p10 = pnand %p2753_p6, %p2752_p8 }
 0xb58   : > { %2177 = dma.done.wait (!%p1858_p10), %s1489_s9, 128  }
 0xb59   : > { %2179 = vsyncadd (!%p1858_p10), %s1489_s9, 4294967168  ;;  %s2754_s27 = smov %s2422_s13  ;;  %p27_p3 = scmp.ge.s32.totalorder %s2412_s22, 4  }
 0xb5a   : > { %s2755_s13 = smov %s2186_s14  ;;  %s2756_s14 = smov %s2190_s15 }
 0xb5b   : > { %s2757_s15 = smov %s2754_s27  ;;  %s2758_s16 = smov %s2412_s22 }
 0xb5c   :  { %29 = sbr.rel (!%p27_p3) target bundleno = 13 (0xd), region = 130 }
 0xb63   :  { %1494 = vsyncpa [#allocation4], 1 }
 0xb64   :  { %1496 = vsyncpa [#allocation4 + $0x1], 1 }
 0xb65   :  { %1497 = vsyncpa [#allocation7], 1 }
 0xb66   :  { %1499 = vsyncpa [#allocation7 + $0x1], 1 }
 0xb67   :  { %1500 = vsyncpa [#allocation10], 1 }
 0xb68   :  { %1501 = vsyncpa [#allocation5], 1 }
 0xb69   :  { %1503 = vsyncpa [#allocation5 + $0x1], 1 }

</bundles_post_ra>
